<compile_context>
chip_gen: v7x
topology: tpu7x:2x2x1
jax: 0.10.0
libtpu: 0.0.40
codegen_flags: <defaults>
</compile_context>

<pallas_src>
import jax
import jax.numpy as jnp
from jax.experimental import pallas as pl
from jax.experimental.pallas import tpu as pltpu

_MIN_CHUNK_BYTES = 512 * 1024   # keep each DMA descriptor well amortized
_MAX_CHUNKS = 4                 # a few outstanding DMAs saturate HBM BW


def _row_chunks(n_rows: int, row_bytes: int):
    """Split [0, n_rows) into 1..4 contiguous chunks, each >= ~512 KiB."""
    total = n_rows * row_bytes
    num = max(1, min(_MAX_CHUNKS, total // _MIN_CHUNK_BYTES))
    base, rem = divmod(n_rows, num)
    chunks, start = [], 0
    for k in range(num):
        size = base + (1 if k < rem else 0)
        if size > 0:
            chunks.append((start, size))
            start += size
    return chunks


def absolute_positional_embedding(emb_weight: jax.Array, x: jax.Array) -> jax.Array:
    """Returns emb_weight[:x.shape[1]][None, :, :] via HBM->HBM Pallas DMA(s)."""
    n = x.shape[1]
    max_seq_len, dim = emb_weight.shape
    assert n <= max_seq_len, "sequence length exceeds max_seq_len"

    # Fast path: the whole table is requested -> zero bytes moved.
    if n == max_seq_len:
        return emb_weight[None, :, :]

    itemsize = jnp.dtype(emb_weight.dtype).itemsize
    chunks = _row_chunks(n, dim * itemsize)
    num_chunks = len(chunks)

    def _kernel(emb_hbm, out_hbm, sem):
        # Start all chunk DMAs (multiple outstanding descriptors), then wait all.
        for k, (start, size) in enumerate(chunks):
            pltpu.make_async_copy(
                emb_hbm.at[pl.ds(start, size)],
                out_hbm.at[pl.ds(start, size)],
                sem.at[k],
            ).start()
        for k, (start, size) in enumerate(chunks):
            pltpu.make_async_copy(
                emb_hbm.at[pl.ds(start, size)],
                out_hbm.at[pl.ds(start, size)],
                sem.at[k],
            ).wait()

    nbytes = n * dim * itemsize
    out2d = pl.pallas_call(
        _kernel,
        out_shape=jax.ShapeDtypeStruct((n, dim), emb_weight.dtype),
        in_specs=[pl.BlockSpec(memory_space=pl.ANY)],   # table stays in HBM, no auto-DMA
        out_specs=pl.BlockSpec(memory_space=pl.ANY),    # output written directly in HBM
        scratch_shapes=[pltpu.SemaphoreType.DMA((num_chunks,))],
        cost_estimate=pl.CostEstimate(
            flops=0, transcendentals=0, bytes_accessed=2 * nbytes),
    )(emb_weight)

    # Leading batch-1 axis is free metadata; added outside the kernel so the
    # DMAs move a plain 2-D (rows, dim) slab.
    return out2d[None, :, :]


if __name__ == "__main__":
    # Small shapes consistent with the module's forward pass.
    dim = 32
    max_seq_len = 64
    B, N = 2, 8

    key = jax.random.PRNGKey(0)
    k_emb, k_x = jax.random.split(key)

    # nn.init.normal_(emb.weight, std=0.02)
    emb_weight = 0.02 * jax.random.normal(k_emb, (max_seq_len, dim), dtype=jnp.float32)
    x = jax.random.normal(k_x, (B, N, dim), dtype=jnp.float32)

    # Kernel path (n < max_seq_len).
    out = absolute_positional_embedding(emb_weight, x)
    out = jax.block_until_ready(out)
    ref = emb_weight[jnp.arange(N)][None, :, :]
    assert out.shape == (1, N, dim), out.shape
    assert out.dtype == jnp.float32, out.dtype
    assert jnp.allclose(out, ref), "mismatch vs reference (kernel path)"

    # Zero-copy fast path (n == max_seq_len).
    x_full = jax.random.normal(k_x, (B, max_seq_len, dim), dtype=jnp.float32)
    out_full = jax.block_until_ready(absolute_positional_embedding(emb_weight, x_full))
    assert out_full.shape == (1, max_seq_len, dim)
    assert jnp.allclose(out_full, emb_weight[None, :, :]), "mismatch vs reference (full path)"

    print("KERNEL_OK")
</pallas_src>

<mosaic_0001>
module attributes {stable_mosaic.version = 11 : i64} {
  func.func @_kernel(%arg0: memref<64x32xf32, #tpu.memory_space<any>>, %arg1: memref<8x32xf32, #tpu.memory_space<any>>, %arg2: memref<1x!tpu.dma_semaphore, #tpu.memory_space<semaphore_mem>>) attributes {dimension_semantics = [], scalar_prefetch = 0 : i64, scratch_operands = 1 : i64, tpu.core_type = #tpu.core_type<tc>} {
    %c0_i32 = arith.constant 0 : i32
    %c0_i32_0 = arith.constant 0 : i32
    %c0_i32_1 = arith.constant 0 : i32
    %0 = tpu.memref_slice %arg0[%c0_i32_0, %c0_i32_1] : memref<64x32xf32, #tpu.memory_space<any>> -> memref<8x32xf32, #tpu.memory_space<any>>
    %c0_i32_2 = arith.constant 0 : i32
    %c0_i32_3 = arith.constant 0 : i32
    %1 = tpu.memref_slice %arg1[%c0_i32_2, %c0_i32_3] : memref<8x32xf32, #tpu.memory_space<any>> -> memref<8x32xf32, #tpu.memory_space<any>>
    %2 = tpu.memref_slice %arg2[%c0_i32] : memref<1x!tpu.dma_semaphore, #tpu.memory_space<semaphore_mem>> -> memref<1x!tpu.dma_semaphore, #tpu.memory_space<semaphore_mem>>
    %3 = tpu.memref_squeeze %2 : memref<1x!tpu.dma_semaphore, #tpu.memory_space<semaphore_mem>> -> memref<!tpu.dma_semaphore, #tpu.memory_space<semaphore_mem>>
    tpu.enqueue_dma source(%0 : memref<8x32xf32, #tpu.memory_space<any>>) target(%1 : memref<8x32xf32, #tpu.memory_space<any>>) target_semaphore(%3 : memref<!tpu.dma_semaphore, #tpu.memory_space<semaphore_mem>>)
    %c0_i32_4 = arith.constant 0 : i32
    %c0_i32_5 = arith.constant 0 : i32
    %c0_i32_6 = arith.constant 0 : i32
    %4 = tpu.memref_slice %arg0[%c0_i32_5, %c0_i32_6] : memref<64x32xf32, #tpu.memory_space<any>> -> memref<8x32xf32, #tpu.memory_space<any>>
    %c0_i32_7 = arith.constant 0 : i32
    %c0_i32_8 = arith.constant 0 : i32
    %5 = tpu.memref_slice %arg1[%c0_i32_7, %c0_i32_8] : memref<8x32xf32, #tpu.memory_space<any>> -> memref<8x32xf32, #tpu.memory_space<any>>
    %6 = tpu.memref_slice %arg2[%c0_i32_4] : memref<1x!tpu.dma_semaphore, #tpu.memory_space<semaphore_mem>> -> memref<1x!tpu.dma_semaphore, #tpu.memory_space<semaphore_mem>>
    %7 = tpu.memref_squeeze %6 : memref<1x!tpu.dma_semaphore, #tpu.memory_space<semaphore_mem>> -> memref<!tpu.dma_semaphore, #tpu.memory_space<semaphore_mem>>
    tpu.wait_dma2 semaphore(%7 : memref<!tpu.dma_semaphore, #tpu.memory_space<semaphore_mem>>) src(%4 : memref<8x32xf32, #tpu.memory_space<any>>) dst(%5 : memref<8x32xf32, #tpu.memory_space<any>>)
    return
  }
}

</mosaic_0001>

<bundles_post_ra>
// kernel: tpu_custom_call.1
= control target key start
LH: loop header
LB: loop body
LE: loop exit
PB: predicated region body
PF: predicated region fallthrough
CT: control target
= control target key end

     0   :  { %s76_s0 = inlined_call_operand.vmem [shape: f32[64,32], index: 0, kind: input, shape index: {}]   ;;  %s77_s1 = inlined_call_operand.hbm [shape: f32[8,32], index: 1, kind: output, shape index: {}]  }
   0x1   :  { %s13_s8 = sshll.u32 %s76_s0, 4  ;;  %s14_s8 = int_to_ptr.vmem [resolvable:$true] %s13_s8 }
   0x2   :  { %s27_s9 = scalar_lea.vmem %s14_s8, 128  ;;  %s31_s10 = scalar_lea.vmem %s14_s8, 1024 }
   0x3   :  { %p28_p0 = scmp.ne.s32.totalorder %s14_s8, %s27_s9  ;;  %p32_p1 = scmp.lt.s32.totalorder %s14_s8, %s14_s8 }
   0x4   :  { %p33_p2 = scmp.lt.s32.totalorder %s31_s10, %s27_s9 }
   0x6   :  { %p34_p3 = por %p33_p2, %p32_p1 }
   0x8   :  { %p35_p4 = pnand %p34_p3, %p28_p0 }
   0xa   :  { %38 = shalt.err (!%p35_p4)  }
   0xb   :  { %s39_s13 = scalar_lea.hbm %s77_s1, 128 }
   0xc   :  { %p40_p5 = scmp.ne.s32.totalorder %s77_s1, %s39_s13  ;;  %p43_p6 = scmp.lt.u32.totalorder %s39_s13, %s77_s1 }
   0xe   :  { %p45_p7 = pnand %p43_p6, %p40_p5 }
  0x10   :  { %48 = shalt.err (!%p45_p7)  }
  0x11   :  { %16 = dma.vmem_to_hbm [thread:$0]  %s14_s8, 128, %s77_s1, [#allocation2] }
  0x12   :  { %49 = dma.done.wait [#allocation2], 128 }
  0x13   :  { %50 = vsyncadd [#allocation2], 4294967168 }
  0x14   :  { %20 = vsyncmov [#allocation2] }
  0x17   :  { %s21_s19 = vpop.sfrf %20 }
  0x18   :  { %p26_p8 = scmp.ne.s32.totalorder %s21_s19, 0 }
  0x1a   :  { %25 = shalt.err (%p26_p8)  }

</bundles_post_ra>
